<compile_context>
chip_gen: v6e
topology: v6e:2x2x1
jax: 0.10.0
libtpu: 0.0.40
codegen_flags: <defaults>
</compile_context>

<pallas_src>
import math

import jax
import jax.numpy as jnp
from jax.experimental import pallas as pl
from jax.experimental.pallas import tpu as pltpu

N_PAD = 8  # sublane-quantum padded matmul width (lanes actually stored = gaze_dim)


def _round_up(x, m):
    return ((x + m - 1) // m) * m


def _make_kernel(gaze_dim):
    def kernel(x_ref, w_ref, b_ref, o_ref):
        # One MXU matmul at N=N_PAD, bias add, then store only the real gaze_dim lanes.
        y = jnp.dot(x_ref[...], w_ref[...], preferred_element_type=jnp.float32)
        o_ref[...] = (y[:, :gaze_dim] + b_ref[...]).astype(o_ref.dtype)

    return kernel


def pad_params(w, b, n_pad=N_PAD):
    """One-time parameter prep (do at load time, not per call).

    w: (latent_dim, gaze_dim)  -> (latent_dim, n_pad), zero padded
    b: (gaze_dim,)             -> (1, gaze_dim)
    """
    latent_dim, gaze_dim = w.shape
    w_p = jnp.zeros((latent_dim, n_pad), w.dtype).at[:, :gaze_dim].set(w)
    b_2d = b.reshape(1, gaze_dim)
    return w_p, b_2d


def _cost_estimate(B, latent_dim, gaze_dim, n_pad, itemsize=4):
    return pl.CostEstimate(
        flops=2 * B * latent_dim * gaze_dim,
        transcendentals=0,
        bytes_accessed=(B * latent_dim + B * gaze_dim + latent_dim * n_pad + gaze_dim)
        * itemsize,
    )


def gaze_regressor(x, w_padded, b_2d, *, tm=4096, small_b_cutoff=1024):
    """y = x @ W + b  (PyTorch nn.Linear semantics; W pre-transposed & 8-lane padded).

    x:        (B, latent_dim) f32
    w_padded: (latent_dim, N_PAD) f32 (columns >= gaze_dim are zero)
    b_2d:     (1, gaze_dim) f32
    Returns:  (B, gaze_dim) f32
    """
    B, latent_dim = x.shape
    n_pad = w_padded.shape[1]
    gaze_dim = b_2d.shape[1]
    kernel = _make_kernel(gaze_dim)
    ce = _cost_estimate(B, latent_dim, gaze_dim, n_pad)

    if B <= small_b_cutoff:
        # Small batch: single VMEM-resident block, no grid, no pipeline overhead.
        return pl.pallas_call(
            kernel,
            out_shape=jax.ShapeDtypeStruct((B, gaze_dim), x.dtype),
            in_specs=[
                pl.BlockSpec(memory_space=pltpu.MemorySpace.VMEM),
                pl.BlockSpec(memory_space=pltpu.MemorySpace.VMEM),
                pl.BlockSpec(memory_space=pltpu.MemorySpace.VMEM),
            ],
            out_specs=pl.BlockSpec(memory_space=pltpu.MemorySpace.VMEM),
            cost_estimate=ce,
        )(x, w_padded, b_2d)

    # Large batch: tile over B (HBM-roofline regime). w/b stay VMEM-resident.
    # Clamp tm so there are >=2 blocks: lets dimension_semantics=("parallel",)
    # actually use both TensorCores on v7x (no-op on single-TC v5e/v6e).
    tm_eff = min(tm, _round_up(pl.cdiv(B, 2), 8))
    n_blocks = pl.cdiv(B, tm_eff)
    out = pl.pallas_call(
        kernel,
        out_shape=jax.ShapeDtypeStruct((B, gaze_dim), x.dtype),
        grid=(n_blocks,),
        in_specs=[
            pl.BlockSpec((tm_eff, latent_dim), lambda i: (i, 0)),
            pl.BlockSpec((latent_dim, n_pad), lambda i: (0, 0)),
            pl.BlockSpec((1, gaze_dim), lambda i: (0, 0)),
        ],
        out_specs=pl.BlockSpec((tm_eff, gaze_dim), lambda i: (i, 0)),
        compiler_params=pltpu.CompilerParams(
            dimension_semantics=("parallel",)  # shards across both TCs on v7x
        ),
        cost_estimate=ce,
    )(x, w_padded, b_2d)
    return out


if __name__ == "__main__":
    # Small shapes consistent with the module: batch=8, latent_dim=32, gaze_dim=2.
    B, latent_dim, gaze_dim = 8, 32, 2

    key = jax.random.PRNGKey(0)
    kx, kw, kb, kx2 = jax.random.split(key, 4)

    # Deterministic init mimicking nn.Linear default: U(-1/sqrt(in), 1/sqrt(in)).
    bound = 1.0 / math.sqrt(latent_dim)
    w = jax.random.uniform(kw, (latent_dim, gaze_dim), jnp.float32, -bound, bound)
    b = jax.random.uniform(kb, (gaze_dim,), jnp.float32, -bound, bound)
    x = jax.random.normal(kx, (B, latent_dim), jnp.float32)

    # One-time parameter prep (8-lane padding of W), outside the per-call path.
    w_padded, b_2d = pad_params(w, b)

    # Small-batch (no-grid) path.
    out = gaze_regressor(x, w_padded, b_2d)
    jax.block_until_ready(out)
    ref = x @ w + b
    assert out.shape == (B, gaze_dim)
    assert jnp.allclose(out, ref, atol=1e-5, rtol=1e-5), "mismatch vs reference (small B)"

    # Large-batch (tiled, parallel-over-B) path with a ragged final block.
    B_big = 3000  # > small_b_cutoff and not a multiple of the tile -> exercises masking
    x_big = jax.random.normal(kx2, (B_big, latent_dim), jnp.float32)
    out_big = gaze_regressor(x_big, w_padded, b_2d)
    jax.block_until_ready(out_big)
    ref_big = x_big @ w + b
    assert out_big.shape == (B_big, gaze_dim)
    assert jnp.allclose(out_big, ref_big, atol=1e-5, rtol=1e-5), "mismatch vs reference (large B)"

    print("KERNEL_OK")
</pallas_src>

<mosaic_0001>
module attributes {stable_mosaic.version = 11 : i64} {
  func.func @kernel(%arg0: memref<8x32xf32, #tpu.memory_space<vmem>>, %arg1: memref<32x8xf32, #tpu.memory_space<vmem>>, %arg2: memref<1x2xf32, #tpu.memory_space<vmem>>, %arg3: memref<8x2xf32, #tpu.memory_space<vmem>>) attributes {dimension_semantics = [], scalar_prefetch = 0 : i64, scratch_operands = 0 : i64, tpu.core_type = #tpu.core_type<tc>} {
    %c0 = arith.constant 0 : index
    %c0_0 = arith.constant 0 : index
    %0 = vector.load %arg0[%c0, %c0_0] : memref<8x32xf32, #tpu.memory_space<vmem>>, vector<8x32xf32>
    %c0_1 = arith.constant 0 : index
    %c0_2 = arith.constant 0 : index
    %1 = vector.load %arg1[%c0_1, %c0_2] : memref<32x8xf32, #tpu.memory_space<vmem>>, vector<32x8xf32>
    %cst = arith.constant dense<0.000000e+00> : vector<8x8xf32>
    %2 = tpu.matmul %0, %1, %cst {dimension_numbers = #tpu.dot_dimension_numbers<[1], [0], [0], [1], [0, 0, 1, 1], [], []>} : vector<8x32xf32>, vector<32x8xf32>, vector<8x8xf32> -> vector<8x8xf32>
    %3 = vector.extract_strided_slice %2 {offsets = [0, 0], sizes = [8, 2], strides = [1, 1]} : vector<8x8xf32> to vector<8x2xf32>
    %c0_3 = arith.constant 0 : index
    %c0_4 = arith.constant 0 : index
    %4 = vector.load %arg2[%c0_3, %c0_4] : memref<1x2xf32, #tpu.memory_space<vmem>>, vector<1x2xf32>
    %5 = vector.broadcast %4 : vector<1x2xf32> to vector<8x2xf32>
    %6 = arith.addf %3, %5 : vector<8x2xf32>
    %c0_5 = arith.constant 0 : index
    %c0_6 = arith.constant 0 : index
    %7 = vector.load %arg3[%c0_5, %c0_6] : memref<8x2xf32, #tpu.memory_space<vmem>>, vector<8x2xf32>
    tpu.vector_store %arg3[%c0_5, %c0_6], %6 {strides = array<i32>} : memref<8x2xf32, #tpu.memory_space<vmem>>, vector<8x2xf32>,
    return
  }
}

</mosaic_0001>

<bundles_post_ra>
// kernel: tpu_custom_call.1
= control target key start
LH: loop header
LB: loop body
LE: loop exit
PB: predicated region body
PF: predicated region fallthrough
CT: control target
= control target key end

     0   :  { %v127_v0 = vmov 0.0   ;;  %vm128_vm0 = vmmov 0   ;;  %vm19_vm1 = vcmask 261120   ;;  %vm101_vm2 = vcmask 15360   ;;  %s170_s1 = inlined_call_operand.vmem [shape: f32[32,8], index: 1, kind: input, shape index: {}]   ;;  %s171_s0 = inlined_call_operand.vmem [shape: f32[8,32], index: 0, kind: input, shape index: {}]   ;;  %s172_s2 = inlined_call_operand.vmem [shape: f32[1,2], index: 2, kind: input, shape index: {}]   ;;  %s173_s3 = inlined_call_operand.vmem [shape: f32[8,2], index: 3, kind: output, shape index: {}]  }
   0x1   :  { %114 = vmatprep.subr.mxu0 %v127_v0  ;;  %v18_v1 = vld [vmem:[%s170_s1 + $0x18] sm:$0xff]  ;;  %v17_v2 = vld [vmem:[%s170_s1 + $0x10] sm:$0xff]  ;;  %122 = vmatprep.mubr.msk.f32.mxu0 %vm128_vm0, %v127_v0  ;;  %v16_v3 = vld [vmem:[%s170_s1 + $0x8] sm:$0xff] }
   0x2   :  { %115 = vmatpush3.msra.mxu0 %v18_v1  ;;  %v15_v4 = vld [vmem:[%s170_s1] sm:$0xff] }
   0x3   :  { %116 = vmatprep.subr.mxu0 %v127_v0  ;;  %v14_v5 = vld [vmem:[%s171_s0] sm:$0xff] }
   0x4   :  { %117 = vmatpush3.msra.mxu0 %v17_v2  ;;  %v108_v6 = vld [vmem:[%s172_s2] ss:$0 sm:$0xff] }
   0x5   :  { %118 = vmatprep.subr.mxu0 %v127_v0 }
   0x6   :  { %119 = vmatpush3.msra.mxu0 %v16_v3 }
   0x7   :  { %120 = vmatprep.subr.mxu0 %v127_v0 }
   0x8   :  { %121 = vmatpush3.msra.mxu0 %v15_v4 }
   0x9   :  { %123 = vmatmul.mubr.msk.f32.vlgmr.msra.gmra.mxu0 %vm19_vm1, %v14_v5 }
  0xc9   :  { %v89_v7 = vpop.f32.mrf.mxu0 }
  0xca   :  { %v100_v8 = vadd.f32 %v108_v6, %v89_v7 }
  0xcb   :  { %v124_v9 = vpop.f32.mrf.mxu0 }
  0xcc   :  { %102 = vst.msk [vmem:[%s173_s3] sm:$0xff] %vm101_vm2, %v100_v8 }

</bundles_post_ra>
